<compile_context>
chip_gen: v7x
topology: tpu7x:2x2x1
jax: 0.10.0
libtpu: 0.0.40
codegen_flags: <defaults>
</compile_context>

<pallas_src>
import jax
import jax.numpy as jnp
from jax import lax
from jax.experimental import pallas as pl
from jax.experimental.pallas import tpu as pltpu

WEIGHT = 1.5          # deterministic scalar weight (module __init__ arg)
POOL_K = 9            # MaxPool2d(kernel_size=9, stride=1, padding=4)
POOL_PAD = 4


# ----------------------------------------------------------------------------
# Kernel 1: C-invariant 0/1 mask = threshold + separable 9x9 max-pool.
# ----------------------------------------------------------------------------
def _mask_kernel(mbp_ref, mask_ref):
    # mbp_ref : (1, 1, H+2P, W+2P) zero-padded mean brightness
    # mask_ref: (1, 1, H, W)       pooled 0/1 mask
    H = mask_ref.shape[2]
    W = mask_ref.shape[3]

    # mask = where(mean_bright <= 0, 0, 1).  Zero padding (done in glue) is
    # equivalent to PyTorch's implicit -inf max-pool padding because the
    # thresholded values are in {0, 1} (>= 0) and every window contains at
    # least one real pixel.
    b = jnp.where(mbp_ref[...] <= 0.0, 0.0, 1.0)

    # Separable 9x9 max-pool, stride 1: 9 maxima along W (lane shifts), then
    # 9 maxima along H (sublane shifts).  18 shifted slices instead of 81.
    row = b[:, :, :, 0:W]
    for dx in range(1, POOL_K):
        row = jnp.maximum(row, b[:, :, :, dx:dx + W])
    out = row[:, :, 0:H, :]
    for dy in range(1, POOL_K):
        out = jnp.maximum(out, row[:, :, dy:dy + H, :])

    mask_ref[...] = out


# ----------------------------------------------------------------------------
# Kernel 2: masked squared-difference reduction, tiled over (N, HW-blk, C-blk).
# ----------------------------------------------------------------------------
def _masked_mse_kernel(x_ref, t_ref, m_ref, out_ref, acc_ref):
    # x_ref/t_ref: (1, c_tile, hw_tile); m_ref: (1, 1, hw_tile)
    # out_ref:     (1, 1, G, 1) per-(n, hw-block) partial sums
    # acc_ref:     (G, hw_tile) VMEM accumulator, G = 8 (sublane tile) or c_tile
    c = pl.program_id(2)

    @pl.when(c == 0)
    def _():
        acc_ref[...] = jnp.zeros_like(acc_ref)

    d = x_ref[0].astype(jnp.float32) - t_ref[0].astype(jnp.float32)
    dd = d * d * m_ref[0]                      # mask in {0,1} => mask == mask**2
    ct, hw = dd.shape
    g = acc_ref.shape[0]
    # Row groups align with the (8,128) sublane tiles, so this reshape is
    # layout-free and the axis-0 reduction is pure vreg adds (VPU only):
    # the steady state is DMA + VPU, no XLU work.
    acc_ref[...] += dd.reshape(ct // g, g, hw).sum(axis=0)

    @pl.when(c == pl.num_programs(2) - 1)
    def _():
        # Single cross-lane reduce per (n, hw-block), out of the steady state.
        out_ref[0, 0] = jnp.sum(acc_ref[...], axis=1, keepdims=True)


# ----------------------------------------------------------------------------
# Generation-aware VMEM budgets and tile selection.
# ----------------------------------------------------------------------------
def _vmem_budgets():
    """Returns (tile_working_set_budget_bytes, vmem_limit_bytes)."""
    cap = 64 << 20
    try:
        cap = int(getattr(pltpu.get_tpu_info(), "vmem_capacity_bytes", cap))
    except Exception:
        pass
    if cap >= (100 << 20):            # v5e / v6e class: 128 MiB VMEM -> big tiles
        return 56 << 20, 96 << 20
    return 22 << 20, 32 << 20         # v7x class: 64 MiB per TC -> conservative


def _select_tiles(C, HW, budget_bytes, n_batch):
    """Pick (c_tile, hw_tile) for the reduction kernel.

    Legality (TPU (8,128) tiling + exact reduction, no padded garbage):
      * c_tile  == C,  or a divisor of C  that is a multiple of 8
      * hw_tile == HW, or a divisor of HW that is a multiple of 128
    Objective: biggest block whose per-step working set fits the budget
    (x + t double-buffered, mask double-buffered, (G, hw_tile) accumulator).
    """
    def c_options():
        opts = {C}
        for ct in range(8, C + 1, 8):
            if C % ct == 0:
                opts.add(ct)
        return sorted(opts, reverse=True)

    def hw_options():
        opts = {HW}
        for ht in range(128, HW + 1, 128):
            if HW % ht == 0:
                opts.add(ht)
        return sorted(opts, reverse=True)

    def footprint(ct, ht):
        g = 8 if ct % 8 == 0 else ct
        return 16 * ct * ht + 8 * ht + 4 * g * ht

    best = None
    for ct in c_options():
        for ht in hw_options():             # descending: first fit is the largest
            if footprint(ct, ht) <= budget_bytes:
                key = (ct * ht, ht)         # biggest block, tiebreak on wider hw
                if best is None or key > best[0]:
                    best = (key, ct, ht)
                break
    if best is None:
        # Pathological shapes: smallest legal block (still correct).
        best = ((0, 0), min(c_options()), min(hw_options()))
    _, c_tile, hw_tile = best

    # v7x megacore: with N == 1 the batch axis gives no parallelism; split the
    # spatial axis (if it stays a big, legal block) so both TensorCores work.
    if n_batch == 1 and hw_tile == HW:
        splits = [ht for ht in hw_options() if ht < HW and ht >= 8 * 128]
        if splits:
            hw_tile = max(splits)
    return c_tile, hw_tile


# ----------------------------------------------------------------------------
# Wrapper.
# ----------------------------------------------------------------------------
def content_loss_forward(input_feat, target, content_img, weight=WEIGHT):
    """Returns (output, content_loss) mirroring ContentLoss.forward."""
    N, C, H, W = input_feat.shape
    HW = H * W
    tile_budget, vmem_limit = _vmem_budgets()

    # --- glue (plain JAX): brightness mean + bilinear resize + zero pad -----
    # TODO(synk): F.interpolate(mode='bilinear', align_corners=False) is matched
    # with jax.image.resize('bilinear', antialias=False, half-pixel centers) in
    # glue, not inside a Pallas kernel.
    mean_bright = (content_img[:, 0:1] + content_img[:, 1:2]
                   + content_img[:, 2:3]) / 3.0
    mean_bright = jax.image.resize(mean_bright, (N, 1, H, W),
                                   method="bilinear", antialias=False)
    mbp = jnp.pad(
        mean_bright,
        ((0, 0), (0, 0), (POOL_PAD, POOL_PAD), (POOL_PAD, POOL_PAD)),
    )
    Hp, Wp = H + 2 * POOL_PAD, W + 2 * POOL_PAD

    # --- kernel 1: compute the C-invariant mask once -------------------------
    # TODO(synk): for extremely large H*W, kernel 1 should also be tiled
    # spatially (needs 4-pixel halos per tile).
    mask = pl.pallas_call(
        _mask_kernel,
        out_shape=jax.ShapeDtypeStruct((N, 1, H, W), jnp.float32),
        grid=(N,),
        in_specs=[pl.BlockSpec((1, 1, Hp, Wp), lambda n: (n, 0, 0, 0))],
        out_specs=pl.BlockSpec((1, 1, H, W), lambda n: (n, 0, 0, 0)),
        compiler_params=pltpu.CompilerParams(
            dimension_semantics=("parallel",),
            vmem_limit_bytes=vmem_limit,
        ),
    )(mbp)

    # --- kernel 2: masked MSE over (N, HW-blocks, C-blocks), lane-dense HW --
    c_tile, hw_tile = _select_tiles(C, HW, tile_budget, N)
    nc = C // c_tile
    nhw = HW // hw_tile
    G = 8 if c_tile % 8 == 0 else c_tile

    x2 = input_feat.reshape(N, C, HW)       # free reshapes (contiguous)
    t2 = target.reshape(N, C, HW)
    m2 = mask.reshape(N, 1, HW)

    partial = pl.pallas_call(
        _masked_mse_kernel,
        out_shape=jax.ShapeDtypeStruct((N, nhw, G, 1), jnp.float32),
        grid=(N, nhw, nc),
        in_specs=[
            pl.BlockSpec((1, c_tile, hw_tile), lambda n, h, c: (n, c, h)),
            pl.BlockSpec((1, c_tile, hw_tile), lambda n, h, c: (n, c, h)),
            pl.BlockSpec((1, 1, hw_tile), lambda n, h, c: (n, 0, h)),  # resident over c
        ],
        out_specs=pl.BlockSpec((1, 1, G, 1), lambda n, h, c: (n, h, 0, 0)),
        scratch_shapes=[pltpu.VMEM((G, hw_tile), jnp.float32)],
        compiler_params=pltpu.CompilerParams(
            dimension_semantics=("parallel", "parallel", "arbitrary"),
            vmem_limit_bytes=vmem_limit,
        ),
    )(x2, t2, m2)

    # MSE(input*mask*w, target*w*mask) = w^2 * sum(mask*(x-t)^2) / count
    loss = (weight * weight) * jnp.sum(partial) / float(N * C * HW)

    # forward() returns the input unchanged — no kernel copy needed.
    return input_feat, loss


# ----------------------------------------------------------------------------
# Pure-JAX reference (mirrors the PyTorch module literally) for verification.
# ----------------------------------------------------------------------------
def _reference_loss(input_feat, target, content_img, weight=WEIGHT):
    N, C, H, W = input_feat.shape
    r = content_img[:, 0:1]
    g = content_img[:, 1:2]
    b = content_img[:, 2:3]
    mean_bright = (r + g + b) / 3.0
    mean_bright = jax.image.resize(mean_bright, (N, 1, H, W),
                                   method="bilinear", antialias=False)
    binm = jnp.where(mean_bright <= 0.0, 0.0, 1.0)
    pooled = lax.reduce_window(
        jnp.pad(binm, ((0, 0), (0, 0), (POOL_PAD, POOL_PAD), (POOL_PAD, POOL_PAD)),
                constant_values=-jnp.inf),
        -jnp.inf, lax.max, (1, 1, POOL_K, POOL_K), (1, 1, 1, 1), "VALID")
    mask = pooled > 0.0
    content = jnp.where(mask, input_feat, 0.0)
    content_target = jnp.where(mask, target * weight, 0.0)
    diff = content * weight - content_target
    return jnp.mean(diff * diff)


if __name__ == "__main__":
    key = jax.random.PRNGKey(0)
    k1, k2, k3 = jax.random.split(key, 3)

    N, C, H, W = 2, 4, 16, 16
    input_feat = jax.random.normal(k1, (N, C, H, W), dtype=jnp.float32)
    target = jax.random.normal(k2, (N, C, H, W), dtype=jnp.float32)
    content_img = jax.random.normal(k3, (N, 3, 32, 32), dtype=jnp.float32)

    out, loss = content_loss_forward(input_feat, target, content_img)
    jax.block_until_ready((out, loss))

    # forward() must be a pass-through of the input
    assert jnp.allclose(out, input_feat), "output should equal input (pass-through)"
    assert jnp.isfinite(loss), "content loss should be finite"

    ref = _reference_loss(input_feat, target, content_img)
    assert jnp.allclose(loss, ref, rtol=1e-5, atol=1e-6), (loss, ref)

    print("KERNEL_OK")
</pallas_src>

<mosaic_0001>
module attributes {stable_mosaic.version = 11 : i64} {
  func.func @_mask_kernel(%arg0: i32, %arg1: memref<1x1x24x24xf32, #tpu.memory_space<vmem>>, %arg2: memref<1x1x16x16xf32, #tpu.memory_space<vmem>>) attributes {dimension_semantics = [#tpu.dimension_semantics<parallel>], iteration_bounds = array<i64: 2>, scalar_prefetch = 0 : i64, scratch_operands = 0 : i64, tpu.core_type = #tpu.core_type<tc>, window_params = [{transform_indices = @transform_0, window_bounds = array<i64: 1, 1, 24, 24>}, {transform_indices = @transform_1, window_bounds = array<i64: 1, 1, 16, 16>}]} {
    %c0 = arith.constant 0 : index
    %c0_0 = arith.constant 0 : index
    %c0_1 = arith.constant 0 : index
    %c0_2 = arith.constant 0 : index
    %0 = vector.load %arg1[%c0, %c0_0, %c0_1, %c0_2] : memref<1x1x24x24xf32, #tpu.memory_space<vmem>>, vector<1x1x24x24xf32>
    %cst = arith.constant 0.000000e+00 : f32
    %1 = vector.broadcast %cst : f32 to vector<1x1x24x24xf32>
    %2 = arith.cmpf ole, %0, %1 : vector<1x1x24x24xf32>
    %cst_3 = arith.constant 0.000000e+00 : f32
    %cst_4 = arith.constant 1.000000e+00 : f32
    %3 = vector.broadcast %cst_3 : f32 to vector<1x1x24x24xf32>
    %4 = vector.broadcast %cst_4 : f32 to vector<1x1x24x24xf32>
    %5 = arith.select %2, %3, %4 : vector<1x1x24x24xi1>, vector<1x1x24x24xf32>
    %6 = vector.extract_strided_slice %5 {offsets = [0, 0, 0, 0], sizes = [1, 1, 24, 16], strides = [1, 1, 1, 1]} : vector<1x1x24x24xf32> to vector<1x1x24x16xf32>
    %7 = vector.extract_strided_slice %5 {offsets = [0, 0, 0, 1], sizes = [1, 1, 24, 16], strides = [1, 1, 1, 1]} : vector<1x1x24x24xf32> to vector<1x1x24x16xf32>
    %8 = arith.maximumf %6, %7 : vector<1x1x24x16xf32>
    %9 = vector.extract_strided_slice %5 {offsets = [0, 0, 0, 2], sizes = [1, 1, 24, 16], strides = [1, 1, 1, 1]} : vector<1x1x24x24xf32> to vector<1x1x24x16xf32>
    %10 = arith.maximumf %8, %9 : vector<1x1x24x16xf32>
    %11 = vector.extract_strided_slice %5 {offsets = [0, 0, 0, 3], sizes = [1, 1, 24, 16], strides = [1, 1, 1, 1]} : vector<1x1x24x24xf32> to vector<1x1x24x16xf32>
    %12 = arith.maximumf %10, %11 : vector<1x1x24x16xf32>
    %13 = vector.extract_strided_slice %5 {offsets = [0, 0, 0, 4], sizes = [1, 1, 24, 16], strides = [1, 1, 1, 1]} : vector<1x1x24x24xf32> to vector<1x1x24x16xf32>
    %14 = arith.maximumf %12, %13 : vector<1x1x24x16xf32>
    %15 = vector.extract_strided_slice %5 {offsets = [0, 0, 0, 5], sizes = [1, 1, 24, 16], strides = [1, 1, 1, 1]} : vector<1x1x24x24xf32> to vector<1x1x24x16xf32>
    %16 = arith.maximumf %14, %15 : vector<1x1x24x16xf32>
    %17 = vector.extract_strided_slice %5 {offsets = [0, 0, 0, 6], sizes = [1, 1, 24, 16], strides = [1, 1, 1, 1]} : vector<1x1x24x24xf32> to vector<1x1x24x16xf32>
    %18 = arith.maximumf %16, %17 : vector<1x1x24x16xf32>
    %19 = vector.extract_strided_slice %5 {offsets = [0, 0, 0, 7], sizes = [1, 1, 24, 16], strides = [1, 1, 1, 1]} : vector<1x1x24x24xf32> to vector<1x1x24x16xf32>
    %20 = arith.maximumf %18, %19 : vector<1x1x24x16xf32>
    %21 = vector.extract_strided_slice %5 {offsets = [0, 0, 0, 8], sizes = [1, 1, 24, 16], strides = [1, 1, 1, 1]} : vector<1x1x24x24xf32> to vector<1x1x24x16xf32>
    %22 = arith.maximumf %20, %21 : vector<1x1x24x16xf32>
    %23 = vector.extract_strided_slice %22 {offsets = [0, 0, 0, 0], sizes = [1, 1, 16, 16], strides = [1, 1, 1, 1]} : vector<1x1x24x16xf32> to vector<1x1x16x16xf32>
    %24 = vector.extract_strided_slice %22 {offsets = [0, 0, 1, 0], sizes = [1, 1, 16, 16], strides = [1, 1, 1, 1]} : vector<1x1x24x16xf32> to vector<1x1x16x16xf32>
    %25 = arith.maximumf %23, %24 : vector<1x1x16x16xf32>
    %26 = vector.extract_strided_slice %22 {offsets = [0, 0, 2, 0], sizes = [1, 1, 16, 16], strides = [1, 1, 1, 1]} : vector<1x1x24x16xf32> to vector<1x1x16x16xf32>
    %27 = arith.maximumf %25, %26 : vector<1x1x16x16xf32>
    %28 = vector.extract_strided_slice %22 {offsets = [0, 0, 3, 0], sizes = [1, 1, 16, 16], strides = [1, 1, 1, 1]} : vector<1x1x24x16xf32> to vector<1x1x16x16xf32>
    %29 = arith.maximumf %27, %28 : vector<1x1x16x16xf32>
    %30 = vector.extract_strided_slice %22 {offsets = [0, 0, 4, 0], sizes = [1, 1, 16, 16], strides = [1, 1, 1, 1]} : vector<1x1x24x16xf32> to vector<1x1x16x16xf32>
    %31 = arith.maximumf %29, %30 : vector<1x1x16x16xf32>
    %32 = vector.extract_strided_slice %22 {offsets = [0, 0, 5, 0], sizes = [1, 1, 16, 16], strides = [1, 1, 1, 1]} : vector<1x1x24x16xf32> to vector<1x1x16x16xf32>
    %33 = arith.maximumf %31, %32 : vector<1x1x16x16xf32>
    %34 = vector.extract_strided_slice %22 {offsets = [0, 0, 6, 0], sizes = [1, 1, 16, 16], strides = [1, 1, 1, 1]} : vector<1x1x24x16xf32> to vector<1x1x16x16xf32>
    %35 = arith.maximumf %33, %34 : vector<1x1x16x16xf32>
    %36 = vector.extract_strided_slice %22 {offsets = [0, 0, 7, 0], sizes = [1, 1, 16, 16], strides = [1, 1, 1, 1]} : vector<1x1x24x16xf32> to vector<1x1x16x16xf32>
    %37 = arith.maximumf %35, %36 : vector<1x1x16x16xf32>
    %38 = vector.extract_strided_slice %22 {offsets = [0, 0, 8, 0], sizes = [1, 1, 16, 16], strides = [1, 1, 1, 1]} : vector<1x1x24x16xf32> to vector<1x1x16x16xf32>
    %39 = arith.maximumf %37, %38 : vector<1x1x16x16xf32>
    %c0_5 = arith.constant 0 : index
    %c0_6 = arith.constant 0 : index
    %c0_7 = arith.constant 0 : index
    %c0_8 = arith.constant 0 : index
    %40 = vector.load %arg2[%c0_5, %c0_6, %c0_7, %c0_8] : memref<1x1x16x16xf32, #tpu.memory_space<vmem>>, vector<1x1x16x16xf32>
    tpu.vector_store %arg2[%c0_5, %c0_6, %c0_7, %c0_8], %39 {strides = array<i32>} : memref<1x1x16x16xf32, #tpu.memory_space<vmem>>, vector<1x1x16x16xf32>,
    return
  }
  func.func @transform_0(%arg0: i32) -> (i32, i32, i32, i32) {
    %c0_i32 = arith.constant 0 : i32
    %c0_i32_0 = arith.constant 0 : i32
    %c0_i32_1 = arith.constant 0 : i32
    %c0_i32_2 = arith.constant 0 : i32
    return %arg0, %c0_i32, %c0_i32_0, %c0_i32_1 : i32, i32, i32, i32
  }
  func.func @transform_1(%arg0: i32) -> (i32, i32, i32, i32) {
    %c0_i32 = arith.constant 0 : i32
    %c0_i32_0 = arith.constant 0 : i32
    %c0_i32_1 = arith.constant 0 : i32
    %c0_i32_2 = arith.constant 0 : i32
    return %arg0, %c0_i32, %c0_i32_0, %c0_i32_1 : i32, i32, i32, i32
  }
}

</mosaic_0001>

<bundles_post_ra>
// kernel: tpu_custom_call.1
= control target key start
LH: loop header
LB: loop body
LE: loop exit
PB: predicated region body
PF: predicated region fallthrough
CT: control target
= control target key end

     0   :  { %6 = vsyncpa [#allocation3], 0  ;;  %s823_s0 = inlined_call_operand.hbm [shape: f32[2,1,24,24], index: 0, kind: input, shape index: {}]   ;;  %s824_s1 = inlined_call_operand.hbm [shape: f32[2,1,16,16], index: 1, kind: output, shape index: {}]  }
   0x1   :  { %8 = vsyncpa [#allocation3 + $0x1], 0 }
   0x2   :  { %9 = vsyncpa [#allocation4], 0 }
   0x3   :  { %11 = vsyncpa [#allocation4 + $0x1], 0  ;;  %s645_s6 = smov 0   ;;  %s647_s7 = smov 0  }
   0x4   :  { %s649_s8 = smov 0   ;;  %s651_s9 = smov 0  }
   0x5 LB: > { %s666_s10 = sadd.s32 4294967295, %s618_s9   ;;  %s408_s11 = sadd.s32 4294967294, %s618_s9   ;;  %s618_s9 = sphi %s651_s9, %s836_s9   ;;  %s614_s8 = sphi %s649_s8, %s835_s8   ;;  %s610_s7 = sphi %s647_s7, %s834_s7   ;;  %s606_s6 = sphi %s645_s6, %s833_s6  }
   0x6   : > { %s670_s12 = sadd.s32 1, %s618_s9   ;;  %s24_s13 = sadd.s32 1, %s614_s8 }
   0x7   : > { %s21_s14 = ssub.s32 %s618_s9, %s670_s12  ;;  %p31_p0 = scmp.ne.s32.totalorder %s614_s8, %s610_s7 }
   0x8   : > { %p22_p1 = scmp.eq.s32.totalorder %s21_s14, 0  ;;  %p32_p2 = scmp.eq.s32.totalorder %s618_s9, 0 }
   0x9   : > { %p37_p3 = scmp.ne.s32.totalorder %s610_s7, %s606_s6  ;;  %p38_p4 = scmp.eq.s32.totalorder %s666_s10, 0 }
   0xa   : > { %s682_s15 = scalar_select %p22_p1, %s614_s8, %s24_s13  }
   0xb   : > { %p33_p5 = por %p32_p2, %p31_p0  ;;  %p684_p6 = por %p38_p4, %p37_p3 }
   0xc   : > { %p61_p7 = scmp.eq.s32.totalorder %s666_s10, 1  ;;  %p67_p8 = scmp.eq.s32.totalorder %s408_s11, 1 }
   0xd   : > { %p435_p10 = scmp.lt.s32.totalorder %s618_s9, 2  ;;  %s87_s19 = sand.u32 1, %s614_s8  }
   0xe   : > { %p691_p11 = por %p61_p7, %p31_p0  ;;  %p695_p12 = por %p67_p8, %p37_p3 }
   0xf   : > { %s421_s20 = smul.u32 384, %s618_s9  ;;  %p706_p13 = pnand %p435_p10, %p33_p5 }
  0x10   : > { %s827_s17 = scalar_select %p691_p11, 1, 0 }
  0x11   : > { %s828_s18 = scalar_select %p695_p12, 1, 0 }
  0x12   : > { %s420_s21 = smul.u32 24, %s87_s19  ;;  %s704_s24 = scalar_lea.hbm %s823_s0, %s421_s20 }
  0x13   : > { %s712_s28 = scalar_lea.sflag [#allocation3], %s87_s19  ;;  %s522_s29 = scalar_lea.hbm %s704_s24, 384 }
  0x14   : > { %s91_s26 = scalar_lea.vmem [#allocation2], %s420_s21  ;;  %p523_p0 = scmp.ne.s32.totalorder %s704_s24, %s522_s29 }
  0x15   : > { %s98_s27 = sshll.u32 %s91_s26, 4  ;;  %p524_p1 = pneg %p706_p13  ;;  %s710_s27 = int_to_ptr.vmem [resolvable:$true] %s98_s27 }
  0x16   : > { %s527_s3 = scalar_lea.hbm %s823_s0, 768  ;;  %p528_p4 = scmp.lt.u32.totalorder %s704_s24, %s823_s0 }
  0x17   : > { %p525_p2 = pnand %p524_p1, %p523_p0  ;;  %p529_p5 = scmp.lt.u32.totalorder %s527_s3, %s522_s29 }
  0x18   : > { %p531_p8 = scmp.lt.u32.totalorder %s522_s29, %s704_s24 }
  0x19   : > { %p526_p3 = pneg %p525_p2  ;;  %p530_p7 = por %p529_p5, %p528_p4 }
  0x1b   : > { %p532_p10 = por %p531_p8, %p530_p7 }
  0x1d   : > { %p533_p9 = pnand %p532_p10, %p526_p3 }
  0x1f   : > { %536 = shalt.err (!%p533_p9)
}
  0x20   : > { %s537_s11 = scalar_lea.vmem %s710_s27, 384  ;;  %s620_s13 = smov [#allocation2]  }
  0x21   : > { %p538_p0 = scmp.ne.s32.totalorder %s710_s27, %s537_s11  ;;  %s542_s14 = sshll.u32 %s620_s13, 4  ;;  %s543_s14 = int_to_ptr.vmem [resolvable:$false] %s542_s14 }
  0x22   : > { %s544_s19 = scalar_lea.vmem %s543_s14, 768  ;;  %p545_p11 = scmp.lt.s32.totalorder %s710_s27, %s543_s14 }
  0x23   : > { %p540_p2 = pnand %p538_p0, %p524_p1  ;;  %p546_p4 = scmp.lt.s32.totalorder %s544_s19, %s537_s11 }
  0x25   : > { %p541_p12 = pneg %p540_p2  ;;  %p547_p5 = por %p546_p4, %p545_p11 }
  0x27   : > { %p548_p7 = pnand %p547_p5, %p541_p12 }
  0x29   : > { %551 = shalt.err (!%p548_p7)
}
  0x2a   : > { %s621_s20 = smov 128   ;;  %s622_s21 = smov 8  }
  0x2b   : > { %430 = dma.hbm_to_vmem [thread:$0]  (!%p706_p13), %s704_s24, 384, %s710_s27, %s712_s28, %s621_s20, %s621_s20, %s622_s21  }
  0x2c   : > { %p412_p9 = scmp.ge.s32.totalorder %s618_s9, 1  ;;  %p106_p1 = scmp.lt.s32.totalorder %s618_s9, 3 }
  0x2e   : > { %p107_p3 = pnand %p412_p9, %p106_p1 }
  0x2f   : > { %s743_s22 = sand.u32 (!%p107_p3), 1, %s610_s7  }
  0x30   : > { %110 = sbr.rel (%p107_p3) target bundleno = 242 (0xf2), region = 24  ;;  %s113_s26 = scalar_lea.sflag (!%p107_p3), [#allocation3], %s743_s22 }
  0x31   : > { %s422_s23 = smul.u32 (!%p107_p3), 24, %s743_s22 }
  0x33   : > { %s116_s29 = scalar_lea.vmem (!%p107_p3), [#allocation2], %s422_s23 }
  0x37   : > { %597 = dma.done.wait (%p684_p6), %s113_s26, 384  }
  0x38   : > { %599 = vsyncadd (%p684_p6), %s113_s26, 4294966912  ;;  %v135_v0 = vld [vmem:[%s116_s29] sm:$0xff]  ;;  %v136_v1 = vld [vmem:[%s116_s29 + $0x8] sm:$0xff]  ;;  %v623_v3 = vmov 1.0   ;;  %s624_s24 = smov 126   ;;  %s625_s25 = smov 127  }
  0x39   : > { %v137_v2 = vld [vmem:[%s116_s29 + $0x10] sm:$0xff]  ;;  %vm138_vm0 = vcmp.le.f32.partialorder %v135_v0, 0.0  ;;  %vm139_vm1 = vcmp.le.f32.partialorder %v136_v1, 0.0  ;;  %s626_s27 = smov 125   ;;  %s627_s16 = smov 124   ;;  %vm246_vm3 = vcmask 1046528  }
  0x3a   : > { %v141_v4 = vsel %vm138_vm0, 0.0, %v623_v3  ;;  %v142_v5 = vsel %vm139_vm1, 0.0, %v623_v3  ;;  %vm140_vm2 = vcmp.le.f32.partialorder %v137_v2, 0.0  ;;  %s628_s28 = smov 123   ;;  %s629_s30 = smov 122   ;;  %vm256_vm4 = vcmask 1045504  }
  0x3b   : > { %v487_v6 = vpack.i.bf16 %v142_v5, %v141_v4  ;;  %v143_v7 = vsel %vm140_vm2, 0.0, %v623_v3  ;;  %s630_s2 = smov 121   ;;  %s631_s3 = smov 120   ;;  %vm266_vm5 = vcmask 1044480   ;;  %vm276_vm6 = vcmask 1043456  }
  0x3c   : > { %s413_s4 = sshll.u32 %s743_s22, 4  ;;  %vm286_vm7 = vcmask 1042432   ;;  %vm296_vm8 = vcmask 1041408   ;;  %vm306_vm9 = vcmask 1040384   ;;  %s419_s5 = sshll.u32 %s666_s10, 8  ;;  %vm318_vm10 = vcmask 130048  }
  0x3d   : > { %488 = vrot.lane.b32.xlu1 %v487_v6, %s624_s24  ;;  %483 = vrot.lane.b32.xlu0 %v487_v6, %s625_s25  ;;  %s134_s11 = scalar_lea.vmem [#allocation5], %s413_s4  ;;  %s775_s20 = scalar_lea.hbm %s824_s1, %s419_s5 }
  0x3e   : > { %s335_s13 = sshll.u32 %s134_s11, 4  ;;  %s322_s10 = scalar_lea.sflag [#allocation4], %s743_s22  ;;  %s777_s13 = int_to_ptr.vmem [resolvable:$true] %s335_s13 }
  0x3f   : > { %s552_s21 = scalar_lea.vmem %s777_s13, 256  ;;  %p830_p11 = scmp.ne.s32.totalorder %s827_s17, 0 }
  0x40   : > { %p553_p6 = scmp.ne.s32.totalorder %s777_s13, %s552_s21  ;;  %s632_s23 = smov [#allocation5]  }
  0x41   : > { %163 = vrot.lane.b32.xlu1 %v143_v7, %s624_s24  ;;  %151 = vrot.lane.b32.xlu0 %v143_v7, %s625_s25  ;;  %s556_s26 = sshll.u32 %s632_s23, 4  ;;  %s557_s26 = int_to_ptr.vmem [resolvable:$false] %s556_s26 }
  0x42   : > { %p554_p12 = pnand %p553_p6, %p830_p11  ;;  %s558_s29 = scalar_lea.vmem %s557_s26, 512 }
  0x43   : > { %p559_p8 = scmp.lt.s32.totalorder %s777_s13, %s557_s26  ;;  %p560_p10 = scmp.lt.s32.totalorder %s558_s29, %s552_s21 }
  0x44   : > { %p555_p13 = pneg %p554_p12 }
  0x45   : > { %175 = vrot.lane.b32.xlu1 %v143_v7, %s626_s27  ;;  %493 = vrot.lane.b32.xlu0 %v487_v6, %s626_s27  ;;  %p561_p0 = por %p560_p10, %p559_p8 }
  0x47   : > { %p562_p2 = pnand %p561_p0, %p555_p13 }
  0x49   : > { %187 = vrot.lane.b32.xlu1 %v143_v7, %s627_s16  ;;  %498 = vrot.lane.b32.xlu0 %v487_v6, %s627_s16 }
  0x4d   : > { %199 = vrot.lane.b32.xlu1 %v143_v7, %s628_s28  ;;  %503 = vrot.lane.b32.xlu0 %v487_v6, %s628_s28 }
  0x51   : > { %211 = vrot.lane.b32.xlu1 %v143_v7, %s629_s30  ;;  %508 = vrot.lane.b32.xlu0 %v487_v6, %s629_s30 }
  0x55   : > { %223 = vrot.lane.b32.xlu1 %v143_v7, %s630_s2  ;;  %513 = vrot.lane.b32.xlu0 %v487_v6, %s630_s2 }
  0x59   : > { %235 = vrot.lane.b32.xlu1 %v143_v7, %s631_s3  ;;  %518 = vrot.lane.b32.xlu0 %v487_v6, %s631_s3 }
  0xaf   : > { %v489_v8 = vpop.permute.xlu1 %488  ;;  %v484_v9 = vpop.permute.xlu0 %483 }
  0xb0   : > { %v485_v14 = vunpack.i.l.bf16 %v484_v9  ;;  %v486_v15 = vunpack.i.h.bf16 %v484_v9  ;;  %v490_v19 = vunpack.i.l.bf16 %v489_v8  ;;  %v491_v21 = vunpack.i.h.bf16 %v489_v8 }
  0xb2   : > { %v156_v20 = vmax.f32 %v141_v4, %v485_v14  ;;  %v157_v22 = vmax.f32 %v142_v5, %v486_v15 }
  0xb3   : > { %v164_v10 = vpop.permute.xlu1 %163  ;;  %v152_v11 = vpop.permute.xlu0 %151 }
  0xb4   : > { %v158_v16 = vmax.f32 %v143_v7, %v152_v11  ;;  %v168_v28 = vmax.f32 %v156_v20, %v490_v19  ;;  %v169_v31 = vmax.f32 %v157_v22, %v491_v21 }
  0xb6   : > { %v170_v23 = vmax.f32 %v158_v16, %v164_v10 }
  0xb7   : > { %v176_v12 = vpop.permute.xlu1 %175  ;;  %v494_v13 = vpop.permute.xlu0 %493 }
  0xb8   : > { %v495_v26 = vunpack.i.l.bf16 %v494_v13  ;;  %v496_v27 = vunpack.i.h.bf16 %v494_v13  ;;  %v182_v30 = vmax.f32 %v170_v23, %v176_v12 }
  0xba   : > { %v180_v35 = vmax.f32 %v168_v28, %v495_v26  ;;  %v181_v37 = vmax.f32 %v169_v31, %v496_v27 }
  0xbb   : > { %v188_v17 = vpop.permute.xlu1 %187  ;;  %v499_v18 = vpop.permute.xlu0 %498 }
  0xbc   : > { %v500_v29 = vunpack.i.l.bf16 %v499_v18  ;;  %v501_v32 = vunpack.i.h.bf16 %v499_v18  ;;  %v194_v38 = vmax.f32 %v182_v30, %v188_v17 }
  0xbe   : > { %v192_v40 = vmax.f32 %v180_v35, %v500_v29  ;;  %v193_v41 = vmax.f32 %v181_v37, %v501_v32 }
  0xbf   : > { %v200_v24 = vpop.permute.xlu1 %199  ;;  %v504_v25 = vpop.permute.xlu0 %503 }
  0xc0   : > { %v505_v36 = vunpack.i.l.bf16 %v504_v25  ;;  %v506_v39 = vunpack.i.h.bf16 %v504_v25  ;;  %v206_v42 = vmax.f32 %v194_v38, %v200_v24 }
  0xc2   : > { %v204_v47 = vmax.f32 %v192_v40, %v505_v36  ;;  %v205_v48 = vmax.f32 %v193_v41, %v506_v39 }
  0xc3   : > { %v212_v33 = vpop.permute.xlu1 %211  ;;  %v509_v34 = vpop.permute.xlu0 %508 }
  0xc4   : > { %v511_v43 = vunpack.i.h.bf16 %v509_v34  ;;  %v510_v44 = vunpack.i.l.bf16 %v509_v34  ;;  %v218_v49 = vmax.f32 %v206_v42, %v212_v33 }
  0xc6   : > { %v216_v52 = vmax.f32 %v204_v47, %v510_v44  ;;  %v217_v53 = vmax.f32 %v205_v48, %v511_v43 }
  0xc7   : > { %v224_v45 = vpop.permute.xlu1 %223  ;;  %v514_v46 = vpop.permute.xlu0 %513 }
  0xc8   : > { %v516_v50 = vunpack.i.h.bf16 %v514_v46  ;;  %v515_v51 = vunpack.i.l.bf16 %v514_v46  ;;  %v230_v54 = vmax.f32 %v218_v49, %v224_v45 }
  0xca   : > { %v228_v59 = vmax.f32 %v216_v52, %v515_v51  ;;  %v229_v60 = vmax.f32 %v217_v53, %v516_v50 }
  0xcb   : > { %v236_v55 = vpop.permute.xlu1 %235  ;;  %v519_v56 = vpop.permute.xlu0 %518 }
  0xcc   : > { %v521_v57 = vunpack.i.h.bf16 %v519_v56  ;;  %v520_v58 = vunpack.i.l.bf16 %v519_v56  ;;  %v751_v61 = vmax.f32 %v230_v54, %v236_v55 }
  0xce   : > { %v240_v62 = vmax.f32 %v228_v59, %v520_v58  ;;  %v753_v63 = vmax.f32 %v229_v60, %v521_v57  ;;  %v250_v0 = vrot.slane %v751_v61, 1  ;;  %v260_v4 = vrot.slane %v751_v61, 2 }
  0xcf   : > { %v270_v10 = vrot.slane %v751_v61, 3  ;;  %v280_v17 = vrot.slane %v751_v61, 4  ;;  %v290_v24 = vrot.slane %v751_v61, 5  ;;  %v300_v31 = vrot.slane %v751_v61, 6 }
  0xd0   : > { %v247_v1 = vrot.slane %v240_v62, 1  ;;  %v248_v2 = vrot.slane %v753_v63, 1  ;;  %v257_v3 = vrot.slane %v240_v62, 2  ;;  %v258_v5 = vrot.slane %v753_v63, 2 }
  0xd1   : > { %v267_v7 = vrot.slane %v240_v62, 3  ;;  %v268_v9 = vrot.slane %v753_v63, 3  ;;  %v277_v13 = vrot.slane %v240_v62, 4  ;;  %v278_v16 = vrot.slane %v753_v63, 4 }
  0xd2   : > { %v249_v6 = vsel %vm246_vm3, %v247_v1, %v248_v2  ;;  %v251_v8 = vsel %vm246_vm3, %v248_v2, %v250_v0  ;;  %v259_v14 = vsel %vm256_vm4, %v257_v3, %v258_v5  ;;  %v261_v15 = vsel %vm256_vm4, %v258_v5, %v260_v4 }
  0xd3   : > { %v254_v11 = vmax.f32 %v240_v62, %v249_v6  ;;  %v255_v12 = vmax.f32 %v753_v63, %v251_v8  ;;  %v287_v20 = vrot.slane %v240_v62, 5  ;;  %v269_v21 = vsel %vm266_vm5, %v267_v7, %v268_v9 }
  0xd4   : > { %v271_v22 = vsel %vm266_vm5, %v268_v9, %v270_v10  ;;  %v288_v23 = vrot.slane %v753_v63, 5  ;;  %v279_v27 = vsel %vm276_vm6, %v277_v13, %v278_v16  ;;  %v281_v28 = vsel %vm276_vm6, %v278_v16, %v280_v17 }
  0xd5   : > { %v264_v18 = vmax.f32 %v254_v11, %v259_v14  ;;  %v265_v19 = vmax.f32 %v255_v12, %v261_v15  ;;  %v297_v29 = vrot.slane %v240_v62, 6  ;;  %v298_v30 = vrot.slane %v753_v63, 6 }
  0xd6   : > { %v289_v34 = vsel %vm286_vm7, %v287_v20, %v288_v23  ;;  %v291_v35 = vsel %vm286_vm7, %v288_v23, %v290_v24  ;;  %v307_v36 = vrot.slane %v240_v62, 7  ;;  %v308_v37 = vrot.slane %v753_v63, 7 }
  0xd7   : > { %v274_v25 = vmax.f32 %v264_v18, %v269_v21  ;;  %v275_v26 = vmax.f32 %v265_v19, %v271_v22  ;;  %v299_v40 = vsel %vm296_vm8, %v297_v29, %v298_v30  ;;  %v301_v41 = vsel %vm296_vm8, %v298_v30, %v300_v31 }
  0xd8   : > { %v310_v42 = vrot.slane %v751_v61, 7  ;;  %v309_v45 = vsel %vm306_vm9, %v307_v36, %v308_v37 }
  0xd9   : > { %v284_v32 = vmax.f32 %v274_v25, %v279_v27  ;;  %v285_v33 = vmax.f32 %v275_v26, %v281_v28 }
  0xda   : > { %v311_v46 = vsel %vm306_vm9, %v308_v37, %v310_v42 }
  0xdb   : > { %v294_v38 = vmax.f32 %v284_v32, %v289_v34  ;;  %v295_v39 = vmax.f32 %v285_v33, %v291_v35 }
  0xdd   : > { %v304_v43 = vmax.f32 %v294_v38, %v299_v40  ;;  %v305_v44 = vmax.f32 %v295_v39, %v301_v41 }
  0xdf   : > { %v314_v47 = vmax.f32 %v304_v43, %v309_v45  ;;  %v315_v48 = vmax.f32 %v305_v44, %v311_v46 }
  0xe1   : > { %v316_v49 = vmax.f32 %v314_v47, %v753_v63  ;;  %v317_v50 = vmax.f32 %v315_v48, %v751_v61 }
  0xe3   : > { %319 = vst.msk [vmem:[%s134_s11] sm:$0xff] %vm318_vm10, %v316_v49  ;;  %320 = vst.msk [vmem:[%s134_s11 + $0x8] sm:$0xff] %vm318_vm10, %v317_v50 }
  0xe4   : > { %565 = shalt.err (!%p562_p2)
}
  0xe5   : > { %s566_s24 = scalar_lea.hbm %s775_s20, 256  ;;  %s570_s16 = scalar_lea.hbm %s824_s1, 512 }
  0xe6   : > { %p567_p4 = scmp.ne.s32.totalorder %s775_s20, %s566_s24  ;;  %p571_p9 = scmp.lt.u32.totalorder %s775_s20, %s824_s1 }
  0xe7   : > { %p572_p1 = scmp.lt.u32.totalorder %s570_s16, %s566_s24  ;;  %p574_p6 = scmp.lt.u32.totalorder %s566_s24, %s775_s20 }
  0xe8   : > { %p568_p5 = pnand %p567_p4, %p830_p11 }
  0xe9   : > { %p573_p3 = por %p572_p1, %p571_p9 }
  0xea   : > { %p569_p7 = pneg %p568_p5 }
  0xeb   : > { %p575_p12 = por %p574_p6, %p573_p3 }
  0xed   : > { %p576_p13 = pnand %p575_p12, %p569_p7 }
  0xef   : > { %579 = shalt.err (!%p576_p13)
}
  0xf0   : > { %s633_s2 = smov 128   ;;  %s634_s3 = smov 8  }
  0xf1   : > { %425 = dma.vmem_to_hbm [thread:$0]  (%p830_p11), %s777_s13, 256, %s775_s20, %s322_s10, %s633_s2, %s633_s2, %s634_s3  }
  0xf2 PF: > { %s350_s4 = sand.u32 1, %s606_s6   ;;  %p831_p8 = scmp.ne.s32.totalorder %s828_s18, 0 }
  0xf3   : > { %p832_p10 = scmp.ge.s32.totalorder %s618_s9, 2  ;;  %s351_s5 = scalar_lea.sflag [#allocation4], %s350_s4 }
  0xf5   : > { %p432_p0 = pnand %p832_p10, %p831_p8 }
  0xf7   : > { %601 = dma.done.wait (!%p432_p0), %s351_s5, 256  }
  0xf8   : > { %603 = vsyncadd (!%p432_p0), %s351_s5, 4294967040  ;;  %p14_p2 = scmp.ge.s32.totalorder %s670_s12, 4   ;;  %s833_s6 = smov %s610_s7 }
  0xf9   : > { %s834_s7 = smov %s614_s8  ;;  %s835_s8 = smov %s682_s15 }
  0xfa   : > { %s836_s9 = smov %s670_s12  ;;  %16 = sbr.rel (!%p14_p2) target bundleno = 5 (0x5), region = 69 }
 0x101   :  { %356 = vsyncpa [#allocation3], 1 }
 0x102   :  { %358 = vsyncpa [#allocation3 + $0x1], 1 }
 0x103   :  { %359 = vsyncpa [#allocation4], 1 }
 0x104   :  { %361 = vsyncpa [#allocation4 + $0x1], 1 }

</bundles_post_ra>
